<compile_context>
chip_gen: v7x
topology: tpu7x:2x2x1
jax: 0.10.0
libtpu: 0.0.40
codegen_flags: <defaults>
</compile_context>

<pallas_src>
import functools
import math

import jax
import jax.numpy as jnp
from jax.experimental import pallas as pl
from jax.experimental.pallas import tpu as pltpu

# Full-precision matmuls in the pure-JAX reference so the check vs the Pallas
# kernels (f32 MXU accumulation) is tight.
jax.config.update("jax_default_matmul_precision", "highest")

_LN_EPS = 1e-5  # PyTorch nn.LayerNorm default


def _detect_vmem_limit():
    # ~75% of physical VMEM: ~48 MiB on v7x (64 MiB/TC), ~96 MiB on v5e/v6e.
    try:
        cap = int(pltpu.get_tpu_info().vmem_capacity_bytes)
    except Exception:
        cap = 64 * 1024 * 1024
    return int(min(cap * 3 // 4, 100 * 1024 * 1024))


_VMEM_LIMIT = _detect_vmem_limit()


def _mosaic_params(*semantics):
    return pltpu.CompilerParams(
        dimension_semantics=tuple(semantics),
        vmem_limit_bytes=_VMEM_LIMIT)


# ----------------------------------------------------------------------------
# Sinusoidal positional-encoding table (== PositionalEncoding.pe, squeezed)
# ----------------------------------------------------------------------------
def build_pe(d_model, max_len=4096, dtype=jnp.float32):
    position = jnp.arange(max_len, dtype=jnp.float32)[:, None]
    div_term = jnp.exp(jnp.arange(0, d_model, 2, dtype=jnp.float32)
                       * (-math.log(10000.0) / d_model))
    pe = jnp.zeros((max_len, d_model), jnp.float32)
    pe = pe.at[:, 0::2].set(jnp.sin(position * div_term))
    pe = pe.at[:, 1::2].set(jnp.cos(position * div_term))
    return pe.astype(dtype)


# ----------------------------------------------------------------------------
# Kernel 1: fused embedding Linear + positional-encoding add
# ----------------------------------------------------------------------------
def _embed_pe_kernel(x_ref, w_ref, b_ref, pe_ref, o_ref):
    # x: (1, ts, d_in)  w: (d_in, D)  b: (1, D)  pe: (ts, D)  o: (1, ts, D)
    y = jnp.dot(x_ref[0], w_ref[...], preferred_element_type=jnp.float32)
    o_ref[0] = (y + b_ref[...] + pe_ref[...]).astype(o_ref.dtype)


def embed_pos_encode(x, w, b, pe, *, vmem_budget=None):
    """x: (B, S, d_in) -> (B, S, D) = x @ w + b + pe[:S] (broadcast over batch)."""
    B, S, d_in = x.shape
    D = w.shape[1]
    budget = vmem_budget if vmem_budget is not None else _VMEM_LIMIT // 2
    bpe = jnp.dtype(x.dtype).itemsize
    resident = 2 * (d_in * D + D) * bpe          # (double-buffered) weight + bias
    per_row = 2 * (d_in + 2 * D) * bpe           # double-buffered x / pe / out rows
    ts = int(max(1, min(S, (budget - resident) // max(per_row, 1))))
    if ts < S:
        ts = max(8, (ts // 8) * 8)               # sublane-aligned tiles when tiling
    grid = (B, pl.cdiv(S, ts))
    return pl.pallas_call(
        _embed_pe_kernel,
        out_shape=jax.ShapeDtypeStruct((B, S, D), x.dtype),
        grid=grid,
        in_specs=[
            pl.BlockSpec((1, ts, d_in), lambda bi, si: (bi, si, 0)),
            pl.BlockSpec((d_in, D), lambda bi, si: (0, 0)),
            pl.BlockSpec((1, D), lambda bi, si: (0, 0)),
            # full pe table passed in; BlockSpec addresses its rows directly
            pl.BlockSpec((ts, D), lambda bi, si: (si, 0)),
        ],
        out_specs=pl.BlockSpec((1, ts, D), lambda bi, si: (bi, si, 0)),
        compiler_params=_mosaic_params("parallel", "parallel"),
    )(x, w, b.reshape(1, D), pe)


# ----------------------------------------------------------------------------
# Kernel 2: row-tiled Linear (used for the fused QKV projection and final FC)
# ----------------------------------------------------------------------------
def _linear_kernel(x_ref, w_ref, b_ref, o_ref):
    y = jnp.dot(x_ref[...], w_ref[...], preferred_element_type=jnp.float32)
    o_ref[...] = (y + b_ref[...]).astype(o_ref.dtype)


def linear(x2d, w, b, *, block_rows=512):
    """x2d: (rows, K) @ w: (K, N) + b: (N,). Rows tiled; K/N held in VMEM."""
    rows, K = x2d.shape
    N = w.shape[1]
    tr = rows if rows <= block_rows else block_rows
    return pl.pallas_call(
        _linear_kernel,
        out_shape=jax.ShapeDtypeStruct((rows, N), x2d.dtype),
        grid=(pl.cdiv(rows, tr),),
        in_specs=[
            pl.BlockSpec((tr, K), lambda i: (i, 0)),
            pl.BlockSpec((K, N), lambda i: (0, 0)),
            pl.BlockSpec((1, N), lambda i: (0, 0)),
        ],
        out_specs=pl.BlockSpec((tr, N), lambda i: (i, 0)),
        compiler_params=_mosaic_params("parallel"),
    )(x2d, w, b.reshape(1, N))


# ----------------------------------------------------------------------------
# Kernel 3: softmax attention — one batch per grid step, heads unrolled,
#           fused (S, 3D) QKV input, lane-dense (S, D) output store.
# ----------------------------------------------------------------------------
def _attention_kernel(qkv_ref, o_ref, *, nhead, dk, scale):
    D = nhead * dk
    qkv = qkv_ref[0]                    # (S, 3D)
    head_outs = []
    for h in range(nhead):              # unrolled at trace time (small H)
        q = qkv[:, h * dk:(h + 1) * dk]
        k = qkv[:, D + h * dk:D + (h + 1) * dk]
        v = qkv[:, 2 * D + h * dk:2 * D + (h + 1) * dk]
        s = jax.lax.dot_general(q, k, (((1,), (1,)), ((), ())),
                                preferred_element_type=jnp.float32) * scale
        s = s - jnp.max(s, axis=-1, keepdims=True)
        p = jnp.exp(s)
        inv = pl.reciprocal(jnp.sum(p, axis=-1, keepdims=True), approx=True)
        p = p * inv
        head_outs.append(jnp.dot(p.astype(v.dtype), v,
                                 preferred_element_type=jnp.float32))
    # Single lane-dense (S, D) store for all heads (no masked dk-wide stores).
    o_ref[0] = jnp.concatenate(head_outs, axis=-1).astype(o_ref.dtype)


def attention(qkv, *, nhead):
    """qkv: (B, S, 3*D) fused projections -> (B, S, D) attention output."""
    B, S, threeD = qkv.shape
    D = threeD // 3
    dk = D // nhead
    # TODO(synk): flash-style KV tiling (online softmax) for large S — full-S
    # (S, S) scores exceed v7x's 64 MiB VMEM at S >= 2048; fine at these sizes.
    return pl.pallas_call(
        functools.partial(_attention_kernel, nhead=nhead, dk=dk,
                          scale=1.0 / math.sqrt(dk)),
        out_shape=jax.ShapeDtypeStruct((B, S, D), qkv.dtype),
        grid=(B,),
        in_specs=[pl.BlockSpec((1, S, threeD), lambda b: (b, 0, 0))],
        out_specs=pl.BlockSpec((1, S, D), lambda b: (b, 0, 0)),
        compiler_params=_mosaic_params("parallel"),
    )(qkv)


# ----------------------------------------------------------------------------
# Kernel 4: O-projection + residual add + LayerNorm (LN as matmul epilogue)
# ----------------------------------------------------------------------------
def _proj_addnorm_kernel(x_ref, w_ref, b_ref, res_ref, g_ref, be_ref, o_ref,
                         *, eps):
    y = jnp.dot(x_ref[...], w_ref[...], preferred_element_type=jnp.float32)
    z = res_ref[...].astype(jnp.float32) + y + b_ref[...]
    mean = jnp.mean(z, axis=-1, keepdims=True)
    zc = z - mean
    var = jnp.mean(zc * zc, axis=-1, keepdims=True)
    inv = jax.lax.rsqrt(var + eps)
    o_ref[...] = (zc * inv * g_ref[...] + be_ref[...]).astype(o_ref.dtype)


def proj_addnorm(x2d, w, b, residual2d, gamma, beta, *, block_rows=512):
    """LayerNorm(residual + x2d @ w + b), fused into one kernel."""
    rows, K = x2d.shape
    N = w.shape[1]
    tr = rows if rows <= block_rows else block_rows
    vec = lambda a: a.reshape(1, -1)
    return pl.pallas_call(
        functools.partial(_proj_addnorm_kernel, eps=_LN_EPS),
        out_shape=jax.ShapeDtypeStruct((rows, N), x2d.dtype),
        grid=(pl.cdiv(rows, tr),),
        in_specs=[
            pl.BlockSpec((tr, K), lambda i: (i, 0)),
            pl.BlockSpec((K, N), lambda i: (0, 0)),
            pl.BlockSpec((1, N), lambda i: (0, 0)),
            pl.BlockSpec((tr, N), lambda i: (i, 0)),
            pl.BlockSpec((1, N), lambda i: (0, 0)),
            pl.BlockSpec((1, N), lambda i: (0, 0)),
        ],
        out_specs=pl.BlockSpec((tr, N), lambda i: (i, 0)),
        compiler_params=_mosaic_params("parallel"),
    )(x2d, w, vec(b), residual2d, vec(gamma), vec(beta))


# ----------------------------------------------------------------------------
# Kernel 5: FFN (linear1 + ReLU + linear2) + residual add + LayerNorm, fused —
#           the (rows, d_ffn) intermediate never touches HBM.
# ----------------------------------------------------------------------------
def _ffn_addnorm_kernel(x_ref, w1_ref, b1_ref, w2_ref, b2_ref, g_ref, be_ref,
                        o_ref, *, eps):
    x = x_ref[...]
    h = jnp.dot(x, w1_ref[...], preferred_element_type=jnp.float32) + b1_ref[...]
    h = jnp.maximum(h, 0.0)
    y = jnp.dot(h.astype(x.dtype), w2_ref[...],
                preferred_element_type=jnp.float32) + b2_ref[...]
    z = x.astype(jnp.float32) + y
    mean = jnp.mean(z, axis=-1, keepdims=True)
    zc = z - mean
    var = jnp.mean(zc * zc, axis=-1, keepdims=True)
    inv = jax.lax.rsqrt(var + eps)
    o_ref[...] = (zc * inv * g_ref[...] + be_ref[...]).astype(o_ref.dtype)


def ffn_addnorm(x2d, w1, b1, w2, b2, gamma, beta, *, block_rows=512):
    rows, D = x2d.shape
    F = w1.shape[1]
    tr = rows if rows <= block_rows else block_rows
    vec = lambda a: a.reshape(1, -1)
    # TODO(synk): for very large d_ffn, add an inner "arbitrary" grid axis over
    # d_ffn with an f32 accumulator scratch; both weights fit VMEM at these sizes.
    return pl.pallas_call(
        functools.partial(_ffn_addnorm_kernel, eps=_LN_EPS),
        out_shape=jax.ShapeDtypeStruct((rows, D), x2d.dtype),
        grid=(pl.cdiv(rows, tr),),
        in_specs=[
            pl.BlockSpec((tr, D), lambda i: (i, 0)),
            pl.BlockSpec((D, F), lambda i: (0, 0)),
            pl.BlockSpec((1, F), lambda i: (0, 0)),
            pl.BlockSpec((F, D), lambda i: (0, 0)),
            pl.BlockSpec((1, D), lambda i: (0, 0)),
            pl.BlockSpec((1, D), lambda i: (0, 0)),
            pl.BlockSpec((1, D), lambda i: (0, 0)),
        ],
        out_specs=pl.BlockSpec((tr, D), lambda i: (i, 0)),
        compiler_params=_mosaic_params("parallel"),
    )(x2d, w1, vec(b1), w2, vec(b2), vec(gamma), vec(beta))


# ----------------------------------------------------------------------------
# Parameter init (mirrors nn.Linear default uniform(-1/sqrt(fan_in), ...));
# Q/K/V weights are stored fused as a single (D, 3D) weight / (3D,) bias.
# ----------------------------------------------------------------------------
def _init_linear(key, fan_in, fan_out, dtype=jnp.float32):
    kw, kb = jax.random.split(key)
    bound = 1.0 / math.sqrt(fan_in)
    w = jax.random.uniform(kw, (fan_in, fan_out), dtype, -bound, bound)
    b = jax.random.uniform(kb, (fan_out,), dtype, -bound, bound)
    return w, b


def init_params(key, *, d_input, d_model, nhead, d_ffn, num_layers, d_output,
                max_len=4096):
    keys = jax.random.split(key, num_layers + 2)
    emb_w, emb_b = _init_linear(keys[0], d_input, d_model)
    layers = []
    for li in range(num_layers):
        lk = jax.random.split(keys[1 + li], 6)
        wq, bq = _init_linear(lk[0], d_model, d_model)
        wk, bk = _init_linear(lk[1], d_model, d_model)
        wv, bv = _init_linear(lk[2], d_model, d_model)
        wo, bo = _init_linear(lk[3], d_model, d_model)
        w1, b1 = _init_linear(lk[4], d_model, d_ffn)
        w2, b2 = _init_linear(lk[5], d_ffn, d_model)
        layers.append(dict(
            wqkv=jnp.concatenate([wq, wk, wv], axis=1),     # fused QKV weight
            bqkv=jnp.concatenate([bq, bk, bv], axis=0),
            wo=wo, bo=bo, w1=w1, b1=b1, w2=w2, b2=b2,
            ln1_g=jnp.ones((d_model,), jnp.float32),
            ln1_b=jnp.zeros((d_model,), jnp.float32),
            ln2_g=jnp.ones((d_model,), jnp.float32),
            ln2_b=jnp.zeros((d_model,), jnp.float32)))
    fc_w, fc_b = _init_linear(keys[-1], d_model, d_output)
    return dict(emb_w=emb_w, emb_b=emb_b, pe=build_pe(d_model, max_len),
                layers=layers, fc_w=fc_w, fc_b=fc_b)


# ----------------------------------------------------------------------------
# Full forward (4 Pallas kernels / layer; reshapes are contiguous = free)
# ----------------------------------------------------------------------------
def encoder_layer(h2, lp, *, B, S, nhead):
    D = h2.shape[-1]
    qkv = linear(h2, lp["wqkv"], lp["bqkv"])                   # one fused matmul
    attn = attention(qkv.reshape(B, S, 3 * D), nhead=nhead)    # (B, S, D)
    h2 = proj_addnorm(attn.reshape(B * S, D), lp["wo"], lp["bo"],
                      h2, lp["ln1_g"], lp["ln1_b"])
    h2 = ffn_addnorm(h2, lp["w1"], lp["b1"], lp["w2"], lp["b2"],
                     lp["ln2_g"], lp["ln2_b"])
    return h2


def transformer_forward(params, x, *, nhead):
    """x: (B, S, d_input) -> (B, d_output). Eval mode (dropout = identity)."""
    # TODO(synk): training-mode dropout and the Mask/Chunk attention variants
    # are not implemented; this is the attn='Origin' eval path.
    B, S, _ = x.shape
    h = embed_pos_encode(x, params["emb_w"], params["emb_b"], params["pe"])
    D = h.shape[-1]
    h2 = h.reshape(B * S, D)
    for lp in params["layers"]:
        h2 = encoder_layer(h2, lp, B=B, S=S, nhead=nhead)
    last = h2.reshape(B, S, D)[:, -1, :]                       # output[:, -1, :]
    return linear(last, params["fc_w"], params["fc_b"])


# ----------------------------------------------------------------------------
# Pure-JAX reference (for the numerical self-check)
# ----------------------------------------------------------------------------
def _layernorm_ref(z, g, b):
    mean = jnp.mean(z, axis=-1, keepdims=True)
    var = jnp.mean((z - mean) ** 2, axis=-1, keepdims=True)
    return (z - mean) * jax.lax.rsqrt(var + _LN_EPS) * g + b


def reference_forward(params, x, *, nhead):
    B, S, _ = x.shape
    h = x @ params["emb_w"] + params["emb_b"] + params["pe"][:S][None]
    D = h.shape[-1]
    dk = D // nhead
    for lp in params["layers"]:
        qkv = h @ lp["wqkv"] + lp["bqkv"]
        q, k, v = jnp.split(qkv, 3, axis=-1)
        heads = lambda z: z.reshape(B, S, nhead, dk).transpose(0, 2, 1, 3)
        q, k, v = heads(q), heads(k), heads(v)
        s = jnp.einsum("bhqd,bhkd->bhqk", q, k) / math.sqrt(dk)
        p = jax.nn.softmax(s, axis=-1)
        a = jnp.einsum("bhqk,bhkd->bhqd", p, v).transpose(0, 2, 1, 3).reshape(B, S, D)
        a = a @ lp["wo"] + lp["bo"]
        h = _layernorm_ref(h + a, lp["ln1_g"], lp["ln1_b"])
        f = jnp.maximum(h @ lp["w1"] + lp["b1"], 0.0) @ lp["w2"] + lp["b2"]
        h = _layernorm_ref(h + f, lp["ln2_g"], lp["ln2_b"])
    return h[:, -1, :] @ params["fc_w"] + params["fc_b"]


# ----------------------------------------------------------------------------
# Demo / self-check
# ----------------------------------------------------------------------------
if __name__ == "__main__":
    d_input, d_model, nhead, d_ffn = 16, 32, 4, 64
    num_layers, d_output = 2, 4
    B, S = 2, 8

    root = jax.random.PRNGKey(0)
    kx, kp = jax.random.split(root)
    x = jax.random.normal(kx, (B, S, d_input), jnp.float32)
    params = init_params(kp, d_input=d_input, d_model=d_model, nhead=nhead,
                         d_ffn=d_ffn, num_layers=num_layers, d_output=d_output)

    out = jax.block_until_ready(transformer_forward(params, x, nhead=nhead))
    assert out.shape == (B, d_output)

    ref = jax.block_until_ready(reference_forward(params, x, nhead=nhead))
    max_err = float(jnp.max(jnp.abs(out - ref)))
    # Margin covers the EUP approx-reciprocal softmax normalization; the f32
    # path otherwise matches the reference to ~1e-4.
    assert jnp.allclose(out, ref, atol=1e-2, rtol=1e-2), (
        f"mismatch vs reference, max abs err {max_err}")

    print("KERNEL_OK")
</pallas_src>

<mosaic_0001>
module attributes {stable_mosaic.version = 11 : i64} {
  func.func @_embed_pe_kernel(%arg0: i32, %arg1: i32, %arg2: memref<1x8x16xf32, #tpu.memory_space<vmem>>, %arg3: memref<16x32xf32, #tpu.memory_space<vmem>>, %arg4: memref<1x32xf32, #tpu.memory_space<vmem>>, %arg5: memref<8x32xf32, #tpu.memory_space<vmem>>, %arg6: memref<1x8x32xf32, #tpu.memory_space<vmem>>) attributes {dimension_semantics = [#tpu.dimension_semantics<parallel>, #tpu.dimension_semantics<parallel>], iteration_bounds = array<i64: 2, 1>, scalar_prefetch = 0 : i64, scratch_operands = 0 : i64, tpu.core_type = #tpu.core_type<tc>, window_params = [{transform_indices = @transform_0, window_bounds = array<i64: 1, 8, 16>}, {pipeline_mode = #tpu.pipeline_mode<synchronous>, transform_indices = @transform_1, window_bounds = array<i64: 16, 32>}, {pipeline_mode = #tpu.pipeline_mode<synchronous>, transform_indices = @transform_2, window_bounds = array<i64: 1, 32>}, {transform_indices = @transform_3, window_bounds = array<i64: 8, 32>}, {transform_indices = @transform_4, window_bounds = array<i64: 1, 8, 32>}]} {
    %c0 = arith.constant 0 : index
    %c0_0 = arith.constant 0 : index
    %c0_1 = arith.constant 0 : index
    %0 = vector.load %arg2[%c0, %c0_0, %c0_1] : memref<1x8x16xf32, #tpu.memory_space<vmem>>, vector<1x8x16xf32>
    %1 = vector.shape_cast %0 : vector<1x8x16xf32> to vector<8x16xf32>
    %c0_2 = arith.constant 0 : index
    %c0_3 = arith.constant 0 : index
    %2 = vector.load %arg3[%c0_2, %c0_3] : memref<16x32xf32, #tpu.memory_space<vmem>>, vector<16x32xf32>
    %cst = arith.constant dense<0.000000e+00> : vector<8x32xf32>
    %3 = tpu.matmul %1, %2, %cst {dimension_numbers = #tpu.dot_dimension_numbers<[1], [0], [0], [1], [0, 0, 1, 1], [], []>, precision = #tpu.contract_precision<fp32>} : vector<8x16xf32>, vector<16x32xf32>, vector<8x32xf32> -> vector<8x32xf32>
    %c0_4 = arith.constant 0 : index
    %c0_5 = arith.constant 0 : index
    %4 = vector.load %arg4[%c0_4, %c0_5] : memref<1x32xf32, #tpu.memory_space<vmem>>, vector<1x32xf32>
    %5 = vector.broadcast %4 : vector<1x32xf32> to vector<8x32xf32>
    %6 = arith.addf %3, %5 : vector<8x32xf32>
    %c0_6 = arith.constant 0 : index
    %c0_7 = arith.constant 0 : index
    %7 = vector.load %arg5[%c0_6, %c0_7] : memref<8x32xf32, #tpu.memory_space<vmem>>, vector<8x32xf32>
    %8 = arith.addf %6, %7 : vector<8x32xf32>
    %c0_8 = arith.constant 0 : index
    %c0_9 = arith.constant 0 : index
    %c0_10 = arith.constant 0 : index
    %9 = vector.load %arg6[%c0_8, %c0_9, %c0_10] : memref<1x8x32xf32, #tpu.memory_space<vmem>>, vector<1x8x32xf32>
    %10 = vector.shape_cast %9 : vector<1x8x32xf32> to vector<8x32xf32>
    %11 = vector.shape_cast %8 : vector<8x32xf32> to vector<1x8x32xf32>
    tpu.vector_store %arg6[%c0_8, %c0_9, %c0_10], %11 {strides = array<i32>} : memref<1x8x32xf32, #tpu.memory_space<vmem>>, vector<1x8x32xf32>,
    return
  }
  func.func @transform_0(%arg0: i32, %arg1: i32) -> (i32, i32, i32) {
    %c0_i32 = arith.constant 0 : i32
    %c0_i32_0 = arith.constant 0 : i32
    return %arg0, %arg1, %c0_i32 : i32, i32, i32
  }
  func.func @transform_1(%arg0: i32, %arg1: i32) -> (i32, i32) {
    %c0_i32 = arith.constant 0 : i32
    %c0_i32_0 = arith.constant 0 : i32
    %c0_i32_1 = arith.constant 0 : i32
    return %c0_i32, %c0_i32_0 : i32, i32
  }
  func.func @transform_2(%arg0: i32, %arg1: i32) -> (i32, i32) {
    %c0_i32 = arith.constant 0 : i32
    %c0_i32_0 = arith.constant 0 : i32
    %c0_i32_1 = arith.constant 0 : i32
    return %c0_i32, %c0_i32_0 : i32, i32
  }
  func.func @transform_3(%arg0: i32, %arg1: i32) -> (i32, i32) {
    %c0_i32 = arith.constant 0 : i32
    %c0_i32_0 = arith.constant 0 : i32
    return %arg1, %c0_i32 : i32, i32
  }
  func.func @transform_4(%arg0: i32, %arg1: i32) -> (i32, i32, i32) {
    %c0_i32 = arith.constant 0 : i32
    %c0_i32_0 = arith.constant 0 : i32
    return %arg0, %arg1, %c0_i32 : i32, i32, i32
  }
}

</mosaic_0001>

<bundles_post_ra>
// kernel: tpu_custom_call.1
= control target key start
LH: loop header
LB: loop body
LE: loop exit
PB: predicated region body
PF: predicated region fallthrough
CT: control target
= control target key end

     0   :  { %9 = vsyncpa [#allocation3], 0  ;;  %s1201_s0 = inlined_call_operand.vmem [shape: f32[2,8,16], index: 0, kind: input, shape index: {}]   ;;  %s1202_s1 = inlined_call_operand.vmem [shape: f32[16,32], index: 1, kind: input, shape index: {}]   ;;  %s1203_s2 = inlined_call_operand.vmem [shape: f32[1,32], index: 2, kind: input, shape index: {}]   ;;  %s1204_s3 = inlined_call_operand.vmem [shape: f32[4096,32], index: 3, kind: input, shape index: {}]   ;;  %s1205_s4 = inlined_call_operand.hbm [shape: f32[2,8,32], index: 4, kind: output, shape index: {}]  }
   0x1   :  { %11 = vsyncpa [#allocation3 + $0x1], 0  ;;  %s1071_s15 = smov 0   ;;  %s1073_s16 = smov 0  }
   0x2   :  { %s1075_s17 = smov 0   ;;  %s1077_s18 = smov 0  }
   0x3   :  { %s1079_s19 = smov 0   ;;  %s1081_s20 = smov 0  }
   0x4 LB: > { %s813_s21 = sadd.s32 4294967295, %s1040_s20   ;;  %s814_s22 = sadd.s32 4294967294, %s1040_s20   ;;  %s1040_s20 = sphi %s1081_s20, %s17_s20   ;;  %s1036_s19 = sphi %s1079_s19, %s1212_s19   ;;  %s1032_s18 = sphi %s1077_s18, %s1211_s18   ;;  %s1028_s17 = sphi %s1075_s17, %s1210_s17   ;;  %s1024_s16 = sphi %s1073_s16, %s1209_s16   ;;  %s1020_s15 = sphi %s1071_s15, %s1208_s15  }
   0x5   : > { %s29_s23 = sadd.s32 1, %s1036_s19  ;;  %s134_s24 = sadd.s32 1, %s1028_s17 }
   0x6   : > { %p31_p0 = scmp.ge.s32.totalorder %s29_s23, 2  ;;  %p144_p1 = scmp.ne.s32.totalorder %s1028_s17, %s1024_s16 }
   0x7   : > { %p145_p2 = scmp.eq.s32.totalorder %s813_s21, 1  ;;  %p150_p3 = scmp.ne.s32.totalorder %s1024_s16, %s1020_s15 }
   0x8   : > { %s1214_s23 = smov (%p31_p0, %s29_s23), 0  ;;  %p151_p5 = scmp.eq.s32.totalorder %s814_s22, 1 }
   0x9   : > { %p1111_p4 = por %p145_p2, %p144_p1  ;;  %s129_s26 = ssub.s32 %s1036_s19, %s1214_s23 }
   0xa   : > { %p818_p6 = scmp.ge.s32.totalorder %s1040_s20, 1  ;;  %p132_p7 = scmp.eq.s32.totalorder %s129_s26, 0 }
   0xb   : > { %p1118_p8 = por %p151_p5, %p150_p3  ;;  %p192_p9 = scmp.lt.s32.totalorder %s1040_s20, 3 }
   0xc   : > { %s1124_s28 = scalar_select %p132_p7, %s1028_s17, %s134_s24  }
   0xd   : > { %p193_p10 = pnand %p818_p6, %p192_p9 }
   0xe   : > { %v236_v0 = vld [vmem:[%s1202_s1] sm:$0xff] (!%p193_p10)  ;;  %v237_v1 = vld [vmem:[%s1202_s1 + $0x8] sm:$0xff] (!%p193_p10)  ;;  %p224_p11 = scmp.lt.s32.totalorder (!%p193_p10), %s1032_s18, 1  ;;  %v1042_v2 = vmov (!%p193_p10), 0.0|0.0   ;;  %vm1043_vm0 = vmmov (!%p193_p10), 0   ;;  %v1044_v5 = vmov (!%p193_p10), 0.0  }
   0xf   : > { %196 = sbr.rel (%p193_p10) target bundleno = 278 (0x116), region = 36  ;;  %886 = vmatprep.subr.bf16.mxu0 (!%p193_p10), %v1042_v2  ;;  %v250_v3 = vand.u32 (!%p193_p10), 4294901760, %v236_v0  ;;  %v253_v4 = vand.u32 (!%p193_p10), 4294901760, %v237_v1  ;;  %889 = vmatprep.subr.bf16.mxu1 (!%p193_p10), %v1042_v2  ;;  %vm245_vm1 = vcmask (!%p193_p10), 130048   ;;  %v821_v25 = vld [vmem:[%s1203_s2] ss:$0 sm:$0xff] (!%p193_p10) }
  0x10   : > { %848 = vmatprep.mubr.msk.f32.mxu0 (!%p193_p10), %vm1043_vm0, %v1044_v5  ;;  %855 = vmatprep.mubr.msk.f32.mxu1 (!%p193_p10), %vm1043_vm0, %v1044_v5  ;;  %s221_s14 = sand.u32 (!%p193_p10), 1, %s1024_s16   ;;  %v708_v43 = vld [vmem:[%s1204_s3] sm:$0xff] (!%p193_p10)  ;;  %s823_s26 = sshll.u32 (!%p193_p10), %s1032_s18, 7  ;;  %vm710_vm2 = vcmask (!%p193_p10), 261120  }
  0x11   : > { %v887_v6 = vpack.c.bf16 (!%p193_p10), %v253_v4, %v250_v3  ;;  %v328_v7 = vsub.f32 (!%p193_p10), %v236_v0, %v250_v3  ;;  %v335_v8 = vsub.f32 (!%p193_p10), %v237_v1, %v253_v4  ;;  %s819_s21 = sshll.u32 (!%p193_p10), %s221_s14, 3 }
  0x12   : > { %s223_s29 = scalar_lea.vmem (!%p193_p10), [#allocation2], %s819_s21 }
  0x13   : > { %888 = vmatpush3.bf16.msra.mxu0 (!%p193_p10), %v887_v6  ;;  %v329_v9 = vand.u32 (!%p193_p10), 4294901760, %v328_v7  ;;  %v336_v10 = vand.u32 (!%p193_p10), 4294901760, %v335_v8  ;;  %v893_v22 = vpack.c.bf16 (!%p193_p10), %v335_v8, %v328_v7  ;;  %s727_s30 = sshll.u32 (!%p193_p10), %s223_s29, 4  ;;  %s1156_s30 = int_to_ptr.vmem [resolvable:$true] %s727_s30 }
  0x14   : > { %892 = vmatprep.subr.bf16.mxu0 (!%p193_p10), %v1042_v2  ;;  %s962_s9 = scalar_lea.vmem (!%p193_p10), %s1156_s30, 128 }
  0x15   : > { %v330_v12 = vsub.f32 (!%p193_p10), %v328_v7, %v329_v9  ;;  %v337_v13 = vsub.f32 (!%p193_p10), %v335_v8, %v336_v10  ;;  %v899_v24 = vpack.c.bf16 (!%p193_p10), %v336_v10, %v329_v9  ;;  %p963_p12 = scmp.ne.s32.totalorder (!%p193_p10), %s1156_s30, %s962_s9 }
  0x16   : > { %s225_s7 = scalar_select %p224_p11, %s1032_s18, 1 }
  0x17   : > { %v331_v16 = vand.u32 4294901760, %v330_v12  ;;  %v338_v17 = vand.u32 4294901760, %v337_v13  ;;  %p964_p13 = pnand %p963_p12, %p1111_p4  ;;  %s1045_s18 = smov [#allocation2]  }
  0x18   : > { %s820_s8 = sshll.u32 %s225_s7, 3  ;;  %s1154_s7 = scalar_lea.hbm %s1205_s4, %s823_s26 }
  0x19   : > { %s230_s11 = scalar_lea.vmem %s1201_s0, %s820_s8  ;;  %v890_v19 = vpack.c.bf16 %v338_v17, %v331_v16  ;;  %s713_s8 = scalar_lea.sflag [#allocation3], %s221_s14 }
  0x1a   : > { %v235_v11 = vld [vmem:[%s230_s11] sm:$0xff]  ;;  %p965_p0 = pneg %p964_p13  ;;  %s966_s10 = sshll.u32 %s1045_s18, 4  ;;  %s967_s10 = int_to_ptr.vmem [resolvable:$false] %s966_s10 }
  0x1b   : > { %v247_v14 = vsel %vm245_vm1, %v235_v11, 0  ;;  %891 = vmatpush3.bf16.msra.mxu1 %v890_v19  ;;  %s968_s11 = scalar_lea.vmem %s967_s10, 256  ;;  %p969_p1 = scmp.lt.s32.totalorder %s1156_s30, %s967_s10 }
  0x1c   : > { %v316_v15 = vand.u32 4294901760, %v247_v14  ;;  %895 = vmatprep.subr.bf16.mxu1 %v1042_v2  ;;  %p970_p2 = scmp.lt.s32.totalorder %s968_s11, %s962_s9 }
  0x1e   : > { %v317_v18 = vsub.f32 %v247_v14, %v316_v15  ;;  %856 = vmatmul.mubr.f32.vlgmr.msra.gmra.mrb[0].mxu1 %v316_v15  ;;  %p971_p3 = por %p970_p2, %p969_p1 }
  0x1f   : > { %897 = vmatpush3.bf16.msra.mxu1 %v887_v6  ;;  %869 = vmatprep.mubr.msk.f32.mxu1 %vm1043_vm0, %v1044_v5 }
  0x20   : > { %v318_v20 = vand.u32 4294901760, %v317_v18  ;;  %901 = vmatprep.subr.bf16.mxu1 %v1042_v2  ;;  %p972_p5 = pnand %p971_p3, %p965_p0 }
  0x22   : > { %v319_v21 = vsub.f32 %v317_v18, %v318_v20  ;;  %870 = vmatmul.mubr.f32.vlgmr.msra.gmra.mrb[2].mxu1 %v318_v20 }
  0x23   : > { %903 = vmatpush3.bf16.msra.mxu1 %v887_v6  ;;  %883 = vmatprep.mubr.msk.f32.mxu1 %vm1043_vm0, %v1044_v5 }
  0x24   : > { %v320_v23 = vand.u32 4294901760, %v319_v21 }
  0x26   : > { %849 = vmatmul.mubr.f32.vlgmr.msra.gmra.mrb[0].mxu0 %v320_v23  ;;  %884 = vmatmul.mubr.f32.vlgmr.msra.gmra.mrb[4].mxu1 %v316_v15 }
  0x27   : > { %894 = vmatpush3.bf16.msra.mxu0 %v893_v22  ;;  %862 = vmatprep.mubr.msk.f32.mxu0 %vm1043_vm0, %v1044_v5 }
  0x28   : > { %898 = vmatprep.subr.bf16.mxu0 %v1042_v2 }
  0x2a   : > { %863 = vmatmul.mubr.f32.vlgmr.msra.gmra.mrb[2].mxu0 %v317_v18 }
  0x2b   : > { %900 = vmatpush3.bf16.msra.mxu0 %v899_v24  ;;  %876 = vmatprep.mubr.msk.f32.mxu0 %vm1043_vm0, %v1044_v5 }
  0x2e   : > { %877 = vmatmul.mubr.f32.vlgmr.msra.gmra.mrb[4].mxu0 %v316_v15 }
  0xf1   : > { %v403_v26 = vpop.f32.mrb[0].mxu1 }
  0xf2   : > { %v857_v27 = vpop.f32.mrb[1].mxu1 }
  0xf5   : > { %v554_v31 = vpop.f32.mrb[2].mxu1 }
  0xf6   : > { %v871_v33 = vpop.f32.mrb[3].mxu1 }
  0xf9   : > { %v322_v28 = vpop.f32.mrb[0].mxu0  ;;  %v704_v37 = vpop.f32.mrb[4].mxu1 }
  0xfa   : > { %v323_v29 = vadd.f32 %v821_v25, %v322_v28  ;;  %v850_v30 = vpop.f32.mrb[1].mxu0  ;;  %v885_v39 = vpop.f32.mrb[5].mxu1 }
  0xfc   : > { %v404_v32 = vadd.f32 %v403_v26, %v323_v29 }
  0xfd   : > { %v479_v34 = vpop.f32.mrb[2].mxu0 }
  0xfe   : > { %v480_v35 = vadd.f32 %v479_v34, %v404_v32  ;;  %v864_v36 = vpop.f32.mrb[3].mxu0 }
 0x100   : > { %v555_v38 = vadd.f32 %v554_v31, %v480_v35 }
 0x101   : > { %v631_v40 = vpop.f32.mrb[4].mxu0 }
 0x102   : > { %v632_v41 = vadd.f32 %v631_v40, %v555_v38  ;;  %v878_v42 = vpop.f32.mrb[5].mxu0 }
 0x104   : > { %v705_v44 = vadd.f32 %v704_v37, %v632_v41 }
 0x106   : > { %v709_v45 = vadd.f32 %v708_v43, %v705_v44 }
 0x108   : > { %711 = vst.msk [vmem:[%s223_s29] sm:$0xff] %vm710_vm2, %v709_v45 }
 0x109   : > { %975 = shalt.err (!%p972_p5)
}
 0x10a   : > { %s976_s12 = scalar_lea.hbm %s1154_s7, 128  ;;  %s980_s21 = scalar_lea.hbm %s1205_s4, 256 }
 0x10b   : > { %p977_p6 = scmp.ne.s32.totalorder %s1154_s7, %s976_s12  ;;  %p981_p10 = scmp.lt.u32.totalorder %s1154_s7, %s1205_s4 }
 0x10c   : > { %p982_p11 = scmp.lt.u32.totalorder %s980_s21, %s976_s12  ;;  %p984_p13 = scmp.lt.u32.totalorder %s976_s12, %s1154_s7 }
 0x10d   : > { %p978_p7 = pnand %p977_p6, %p1111_p4 }
 0x10e   : > { %p983_p12 = por %p982_p11, %p981_p10 }
 0x10f   : > { %p979_p9 = pneg %p978_p7 }
 0x110   : > { %p985_p0 = por %p984_p13, %p983_p12 }
 0x112   : > { %p986_p1 = pnand %p985_p0, %p979_p9 }
 0x114   : > { %989 = shalt.err (!%p986_p1)
}
 0x115   : > { %904 = dma.vmem_to_hbm [thread:$0]  (%p1111_p4), %s1156_s30, 128, %s1154_s7, %s713_s8  }
 0x116 PF: > { %p910_p2 = scmp.ge.s32.totalorder %s1040_s20, 2  ;;  %s739_s26 = sand.u32 1, %s1020_s15  }
 0x117   : > { %s740_s29 = scalar_lea.sflag [#allocation3], %s739_s26 }
 0x118   : > { %p907_p3 = pnand %p910_p2, %p1118_p8 }
 0x11a   : > { %1015 = dma.done.wait (!%p907_p3), %s740_s29, 128  }
 0x11b   : > { %1017 = vsyncadd (!%p907_p3), %s740_s29, 4294967168  ;;  %s17_s20 = sadd.s32 1, %s1040_s20   ;;  %s1208_s15 = smov %s1024_s16 }
 0x11c   : > { %p14_p5 = scmp.ge.s32.totalorder %s17_s20, 4   ;;  %s1209_s16 = smov %s1028_s17 }
 0x11d   : > { %s1210_s17 = smov %s1124_s28  ;;  %s1211_s18 = smov %s1036_s19 }
 0x11e   : > { %s1212_s19 = smov %s1214_s23  ;;  %16 = sbr.rel (!%p14_p5) target bundleno = 4 (0x4), region = 74 }
 0x125   :  { %745 = vsyncpa [#allocation3], 1 }
 0x126   :  { %747 = vsyncpa [#allocation3 + $0x1], 1 }

</bundles_post_ra>
